<compile_context>
chip_gen: v5e
topology: v5e:2x2
jax: 0.10.0
libtpu: 0.0.40
codegen_flags: <defaults>
</compile_context>

<pallas_src>
import math
import numpy as np
import jax
import jax.numpy as jnp
from jax.experimental import pallas as pl
from jax.experimental.pallas import tpu as pltpu

# ----------------------- small config consistent with the module -----------------------
NUM_ACTIONS = 4
INPUT_DIMS = [16, 32]                    # per-split observation widths
SINGLE_DIMS = [8, 8]                     # siamese single-stream width per split
N_PARALLELS = [2, 4]                     # number of siamese streams per split
SIAM_HIDDEN = [[32, 16], [32, 16]]       # parallel_hidden_layers per split
OUT_SPLIT_HIDDEN = [[32], [24]]          # output_hidden_layers per split
FINAL_HIDDEN = [32]                      # out_hidden_dims of the final_mlp
ACTOR_OUT = 2 * NUM_ACTIONS              # num_actions * 2 logits
CRITIC_OUT = 1
OBS_DIM = sum(INPUT_DIMS)                # 48
BETA_INITIAL_LOGIT = 0.5
BETA_INITIAL_SCALE = 5.0
LOGIT_SHIFT = math.log(BETA_INITIAL_LOGIT / (1.0 - BETA_INITIAL_LOGIT))  # 0.0

N_SPLITS = len(INPUT_DIMS)
N_SIAM_LAYERS = len(SIAM_HIDDEN[0])
N_OUTSPLIT_LAYERS = len(OUT_SPLIT_HIDDEN[0])
for _s in range(N_SPLITS):
    assert N_PARALLELS[_s] * SINGLE_DIMS[_s] == INPUT_DIMS[_s]


def _rup(x, m):
    return ((x + m - 1) // m) * m


# ------------------------- static fused-layer geometry (host) --------------------------
def _single_net_widths(out_dim):
    widths = []
    for l in range(N_SIAM_LAYERS):
        widths.append(sum(N_PARALLELS[s] * SIAM_HIDDEN[s][l] for s in range(N_SPLITS)))
    for l in range(N_OUTSPLIT_LAYERS):
        widths.append(sum(OUT_SPLIT_HIDDEN[s][l] for s in range(N_SPLITS)))
    widths.extend(FINAL_HIDDEN)
    widths.append(out_dim)
    return widths


FUSED_OUT = [a + c for a, c in zip(_single_net_widths(ACTOR_OUT), _single_net_widths(CRITIC_OUT))]
N_LAYERS = len(FUSED_OUT)                       # 5
ACTS = tuple(["elu"] * N_SIAM_LAYERS
             + ["elu"] + ["relu"] * (N_OUTSPLIT_LAYERS - 1)
             + ["elu"] * len(FINAL_HIDDEN) + ["none"])

COL_PADS = [_rup(w, 128) for w in FUSED_OUT]    # [384, 256, 128, 128, 128]
K_DIMS = [OBS_DIM] + COL_PADS[:-1]              # [48, 384, 256, 128, 128] (weight rows)
OUT_PAD = COL_PADS[-1]                          # 128 (lane-dense main output)

# Split layers across two right-sized slabs: wide (>128 lanes) and narrow (<=128 lanes).
WIDE_LAYERS = tuple(l for l in range(N_LAYERS) if COL_PADS[l] > 128)      # (0, 1)
NARROW_LAYERS = tuple(l for l in range(N_LAYERS) if COL_PADS[l] <= 128)   # (2, 3, 4)


def _slab_geometry(layers):
    offs = {}
    off = 0
    for l in layers:
        offs[l] = off
        off += K_DIMS[l]
    b_off = _rup(off, 16)          # bias block starts on a bf16 (16,128) tile boundary
    rows = b_off + 16              # one aligned 16-row bias block
    cols = max(COL_PADS[l] for l in layers)
    return offs, b_off, rows, cols


WIDE_OFFS, WIDE_B_OFF, WIDE_ROWS, WIDE_COLS = _slab_geometry(WIDE_LAYERS)          # 448 x 384
NARROW_OFFS, NARROW_B_OFF, NARROW_ROWS, NARROW_COLS = _slab_geometry(NARROW_LAYERS)  # 528 x 128
WIDE_BIAS_IDX = {l: i for i, l in enumerate(WIDE_LAYERS)}
NARROW_BIAS_IDX = {l: i for i, l in enumerate(NARROW_LAYERS)}


# --------------------------------- Pallas kernel ---------------------------------------
def _elu(v):
    return jnp.where(v > 0, v, jnp.exp(jnp.minimum(v, 0.0)) - 1.0)


def _sigmoid(v):
    return 1.0 / (1.0 + jnp.exp(-v))


def _softplus(v):
    # numerically stable softplus using only exp/log (guaranteed Mosaic lowerings)
    return jnp.maximum(v, 0.0) + jnp.log(1.0 + jnp.exp(-jnp.abs(v)))


def _ac_fused_kernel(x_ref, w_wide_ref, w_narrow_ref, o_ref, mean_ref, alpha_ref, beta_ref):
    """Fused actor+critic ParallelSiameseMLP forward + Beta-head epilogue, one batch tile.

    x_ref        : [TB, 48]   raw observations (f32)
    w_wide_ref   : [448, 384] bf16 block-diag weights+biases for layers 0-1
    w_narrow_ref : [528, 128] bf16 block-diag weights+biases for layers 2-4
    o_ref        : [TB, 128]  lanes 0:8 actor logits, lane 8 critic value, rest zero
    mean_ref     : [TB, 4]    sigmoid(action logits)      (act_inference)
    alpha_ref    : [TB, 4]    Beta alpha                  (get_beta_parameters)
    beta_ref     : [TB, 4]    Beta beta                   (get_beta_parameters)
    """
    # one aligned bias-block load per slab, kept in f32
    b_wide = w_wide_ref[WIDE_B_OFF:WIDE_B_OFF + 16, :].astype(jnp.float32)
    b_narrow = w_narrow_ref[NARROW_B_OFF:NARROW_B_OFF + 16, :].astype(jnp.float32)

    h = x_ref[...]
    for l in range(N_LAYERS):                              # statically unrolled (5 layers)
        cols = COL_PADS[l]
        if l in WIDE_BIAS_IDX:
            r0 = WIDE_OFFS[l]
            w = w_wide_ref[r0:r0 + K_DIMS[l], 0:cols]
            i = WIDE_BIAS_IDX[l]
            b = b_wide[i:i + 1, 0:cols]
        else:
            r0 = NARROW_OFFS[l]
            w = w_narrow_ref[r0:r0 + K_DIMS[l], 0:cols]
            i = NARROW_BIAS_IDX[l]
            b = b_narrow[i:i + 1, 0:cols]
        # bf16 MXU operands, f32 accumulation; bias-add / activation in f32
        h = jnp.dot(h.astype(jnp.bfloat16), w, preferred_element_type=jnp.float32) + b
        if ACTS[l] == "elu":
            h = _elu(h)
        elif ACTS[l] == "relu":
            h = jnp.maximum(h, 0.0)

    o_ref[...] = h                                          # lane-dense main output

    # fused Beta-head epilogue (f32; EUP/VPU slack in this MXU-issue-bound kernel)
    ratio = _sigmoid(h[:, 0:NUM_ACTIONS] + LOGIT_SHIFT)
    total = (_softplus(h[:, NUM_ACTIONS:2 * NUM_ACTIONS]) + 1.0) * BETA_INITIAL_SCALE
    alpha = ratio * total
    mean_ref[...] = ratio
    alpha_ref[...] = alpha + 1e-6
    beta_ref[...] = total - alpha + 1e-4


# ----------------------------- parameters (PyTorch layout) -----------------------------
def make_net_params(key, out_dim):
    """Per-layer (W[in,out], b[out]) params of one ParallelSiameseMLP.

    Parameters are stored at bf16 precision (the kernel slab dtype) so the f32 reference
    and the Pallas kernel see numerically identical weights.
    """
    keys = iter(jax.random.split(key, 64))
    scale = 0.1

    def lin(din, dout):
        w = jax.random.normal(next(keys), (din, dout), jnp.float32) * scale
        b = jax.random.normal(next(keys), (dout,), jnp.float32) * scale
        w = w.astype(jnp.bfloat16).astype(jnp.float32)
        b = b.astype(jnp.bfloat16).astype(jnp.float32)
        return (w, b)

    p = {"siam": [], "out_split": [], "final": []}
    for s in range(N_SPLITS):
        dims = [SINGLE_DIMS[s]] + SIAM_HIDDEN[s]
        p["siam"].append([lin(dims[i], dims[i + 1]) for i in range(len(dims) - 1)])
        odims = [N_PARALLELS[s] * SIAM_HIDDEN[s][-1]] + OUT_SPLIT_HIDDEN[s]
        p["out_split"].append([lin(odims[i], odims[i + 1]) for i in range(len(odims) - 1)])
    fin_in = sum(o[-1] for o in OUT_SPLIT_HIDDEN)
    dims = [fin_in] + FINAL_HIDDEN + [out_dim]
    p["final"] = [lin(dims[i], dims[i + 1]) for i in range(len(dims) - 1)]
    return p


# --------------------- host-side fusion into two packed weight slabs -------------------
def _block_diag(blocks):
    rows = sum(b.shape[0] for b in blocks)
    cols = sum(b.shape[1] for b in blocks)
    out = np.zeros((rows, cols), np.float32)
    r = c = 0
    for b in blocks:
        out[r:r + b.shape[0], c:c + b.shape[1]] = b
        r += b.shape[0]
        c += b.shape[1]
    return out


def _dense_layers(p):
    """One ParallelSiameseMLP -> list of dense (W, b) fused over parallels and splits."""
    layers = []
    for l in range(N_SIAM_LAYERS):                         # shared siamese weights: repeat per parallel
        bw, bb = [], []
        for s in range(N_SPLITS):
            W, b = p["siam"][s][l]
            W, b = np.asarray(W), np.asarray(b)
            for _ in range(N_PARALLELS[s]):
                bw.append(W)
                bb.append(b)
        layers.append((_block_diag(bw), np.concatenate(bb)))
    for l in range(N_OUTSPLIT_LAYERS):                     # per-split output_mlp
        bw = [np.asarray(p["out_split"][s][l][0]) for s in range(N_SPLITS)]
        bb = [np.asarray(p["out_split"][s][l][1]) for s in range(N_SPLITS)]
        layers.append((_block_diag(bw), np.concatenate(bb)))
    for (W, b) in p["final"]:                              # final_mlp (already dense)
        layers.append((np.asarray(W), np.asarray(b)))
    return layers


def build_fused_slabs(actor_p, critic_p):
    """Precompute (once, host-side) the two packed bf16 weight slabs for actor+critic."""
    a_layers = _dense_layers(actor_p)
    c_layers = _dense_layers(critic_p)
    wide = np.zeros((WIDE_ROWS, WIDE_COLS), np.float32)
    narrow = np.zeros((NARROW_ROWS, NARROW_COLS), np.float32)
    for l, ((Wa, ba), (Wc, bc)) in enumerate(zip(a_layers, c_layers)):
        if l == 0:
            W = np.concatenate([Wa, Wc], axis=1)           # both nets share the observation rows
        else:
            W = _block_diag([Wa, Wc])                      # actor lanes | critic lanes
        b = np.concatenate([ba, bc])
        if l in WIDE_BIAS_IDX:
            slab, r0, brow = wide, WIDE_OFFS[l], WIDE_B_OFF + WIDE_BIAS_IDX[l]
        else:
            slab, r0, brow = narrow, NARROW_OFFS[l], NARROW_B_OFF + NARROW_BIAS_IDX[l]
        assert W.shape[0] <= K_DIMS[l] and W.shape[1] <= COL_PADS[l]
        slab[r0:r0 + W.shape[0], :W.shape[1]] = W
        slab[brow, :b.shape[0]] = b
    return jnp.asarray(wide, jnp.bfloat16), jnp.asarray(narrow, jnp.bfloat16)


# -------------------------------------- forward ----------------------------------------
def _pick_tile(batch):
    """Batch tile: single tile below 128 rows; otherwise 128..512 with >=2 tiles (v7x)."""
    if batch < 128:
        return max(_rup(batch, 8), 8)
    tb = 512
    while tb > 128 and _rup(batch, tb) // tb < 2:
        tb //= 2
    return tb


@jax.jit
def ac_forward(obs, w_wide, w_narrow):
    """Returns (logits [B,2A], value [B,1], action_mean [B,A], alpha [B,A], beta [B,A])."""
    B = obs.shape[0]
    TB = _pick_tile(B)
    Bp = _rup(B, TB)
    x = obs.astype(jnp.float32)
    if Bp != B:
        x = jnp.zeros((Bp, OBS_DIM), jnp.float32).at[:B, :].set(x)

    out, mean_p, alpha_p, beta_p = pl.pallas_call(
        _ac_fused_kernel,
        out_shape=(
            jax.ShapeDtypeStruct((Bp, OUT_PAD), jnp.float32),
            jax.ShapeDtypeStruct((Bp, NUM_ACTIONS), jnp.float32),
            jax.ShapeDtypeStruct((Bp, NUM_ACTIONS), jnp.float32),
            jax.ShapeDtypeStruct((Bp, NUM_ACTIONS), jnp.float32),
        ),
        grid_spec=pltpu.PrefetchScalarGridSpec(
            num_scalar_prefetch=0,
            grid=(Bp // TB,),
            in_specs=[
                pl.BlockSpec((TB, OBS_DIM), lambda i: (i, 0)),            # unpadded obs tile
                pl.BlockSpec((WIDE_ROWS, WIDE_COLS), lambda i: (0, 0)),   # resident wide slab
                pl.BlockSpec((NARROW_ROWS, NARROW_COLS), lambda i: (0, 0)),  # resident narrow slab
            ],
            out_specs=[
                pl.BlockSpec((TB, OUT_PAD), lambda i: (i, 0)),
                pl.BlockSpec((TB, NUM_ACTIONS), lambda i: (i, 0)),
                pl.BlockSpec((TB, NUM_ACTIONS), lambda i: (i, 0)),
                pl.BlockSpec((TB, NUM_ACTIONS), lambda i: (i, 0)),
            ],
        ),
        compiler_params=pltpu.CompilerParams(dimension_semantics=("parallel",)),
    )(x, w_wide, w_narrow)

    logits = out[:B, :ACTOR_OUT]
    value = out[:B, ACTOR_OUT:ACTOR_OUT + CRITIC_OUT]
    return logits, value, mean_p[:B], alpha_p[:B], beta_p[:B]


def fused_forward(obs, w_wide, w_narrow):
    logits, value, *_ = ac_forward(obs, w_wide, w_narrow)
    return logits, value


def act_inference(obs, w_wide, w_narrow):
    return ac_forward(obs, w_wide, w_narrow)[2]


def evaluate(obs, w_wide, w_narrow):
    return ac_forward(obs, w_wide, w_narrow)[1]


def get_beta_parameters(logits):
    """Pure-JAX post-processing (API parity with the PyTorch module)."""
    ratio = jax.nn.sigmoid(logits[:, :NUM_ACTIONS] + LOGIT_SHIFT)
    total = (jax.nn.softplus(logits[:, NUM_ACTIONS:]) + 1.0) * BETA_INITIAL_SCALE
    alpha = ratio * total
    beta = total - alpha
    return alpha + 1e-6, beta + 1e-4


# ------------------------------ pure-JAX reference (spec) ------------------------------
def reference_net(x, p):
    """Faithful re-implementation of ParallelSiameseMLP.forward (PyTorch semantics)."""
    elu = jax.nn.elu
    subs = []
    off = 0
    for s in range(N_SPLITS):
        xs = x[:, off:off + INPUT_DIMS[s]]
        off += INPUT_DIMS[s]
        xs = xs.reshape(x.shape[0], N_PARALLELS[s], SINGLE_DIMS[s])
        outs = []
        for i in range(N_PARALLELS[s]):
            h = xs[:, i]
            for (W, b) in p["siam"][s]:
                h = elu(h @ W + b)
            outs.append(h)
        h = jnp.concatenate(outs, axis=1)
        for li, (W, b) in enumerate(p["out_split"][s]):
            h = h @ W + b
            h = elu(h) if li == 0 else jax.nn.relu(h)
        subs.append(h)
    h = jnp.concatenate(subs, axis=1)
    for (W, b) in p["final"][:-1]:
        h = elu(h @ W + b)
    W, b = p["final"][-1]
    return h @ W + b


# ----------------------------------------- main -----------------------------------------
if __name__ == "__main__":
    key = jax.random.PRNGKey(0)
    k_obs, k_actor, k_critic = jax.random.split(key, 3)

    actor_params = make_net_params(k_actor, ACTOR_OUT)
    critic_params = make_net_params(k_critic, CRITIC_OUT)
    # host precompute, done exactly once (not per forward call)
    w_wide, w_narrow = build_fused_slabs(actor_params, critic_params)

    # tiny batch (single-tile latency path), medium (<128 single tile), rollout-sized (2 tiles)
    for batch in (2, 96, 640):
        obs = jax.random.normal(k_obs, (batch, OBS_DIM), jnp.float32)

        logits, value, mean, alpha, beta = ac_forward(obs, w_wide, w_narrow)
        jax.block_until_ready((logits, value, mean, alpha, beta))

        # network forward vs pure-JAX reference
        ref_logits = reference_net(obs, actor_params)
        ref_value = reference_net(obs, critic_params)
        np.testing.assert_allclose(np.asarray(logits), np.asarray(ref_logits), rtol=1e-2, atol=1e-2)
        np.testing.assert_allclose(np.asarray(value), np.asarray(ref_value), rtol=1e-2, atol=1e-2)

        # fused Beta-head epilogue vs pure-JAX post-processing of the kernel logits
        ref_mean = jax.nn.sigmoid(logits[:, :NUM_ACTIONS] + LOGIT_SHIFT)
        ref_alpha, ref_beta = get_beta_parameters(logits)
        np.testing.assert_allclose(np.asarray(mean), np.asarray(ref_mean), rtol=1e-3, atol=1e-3)
        np.testing.assert_allclose(np.asarray(alpha), np.asarray(ref_alpha), rtol=1e-3, atol=1e-3)
        np.testing.assert_allclose(np.asarray(beta), np.asarray(ref_beta), rtol=1e-3, atol=1e-3)

        # module-level API wrappers
        actions_mean = act_inference(obs, w_wide, w_narrow)
        val = evaluate(obs, w_wide, w_narrow)
        jax.block_until_ready((actions_mean, val))
        assert actions_mean.shape == (batch, NUM_ACTIONS)
        assert alpha.shape == (batch, NUM_ACTIONS) and beta.shape == (batch, NUM_ACTIONS)
        assert val.shape == (batch, 1)

    print("KERNEL_OK")
</pallas_src>

<mosaic_0001>
module attributes {stable_mosaic.version = 11 : i64} {
  func.func @_ac_fused_kernel(%arg0: i32, %arg1: memref<8x48xf32, #tpu.memory_space<vmem>>, %arg2: memref<448x384xbf16, #tpu.memory_space<vmem>>, %arg3: memref<528x128xbf16, #tpu.memory_space<vmem>>, %arg4: memref<8x128xf32, #tpu.memory_space<vmem>>, %arg5: memref<8x4xf32, #tpu.memory_space<vmem>>, %arg6: memref<8x4xf32, #tpu.memory_space<vmem>>, %arg7: memref<8x4xf32, #tpu.memory_space<vmem>>) attributes {dimension_semantics = [#tpu.dimension_semantics<parallel>], iteration_bounds = array<i64: 1>, scalar_prefetch = 0 : i64, scratch_operands = 0 : i64, tpu.core_type = #tpu.core_type<tc>, window_params = [{transform_indices = @transform_0, window_bounds = array<i64: 8, 48>}, {pipeline_mode = #tpu.pipeline_mode<synchronous>, transform_indices = @transform_1, window_bounds = array<i64: 448, 384>}, {pipeline_mode = #tpu.pipeline_mode<synchronous>, transform_indices = @transform_2, window_bounds = array<i64: 528, 128>}, {transform_indices = @transform_3, window_bounds = array<i64: 8, 128>}, {transform_indices = @transform_4, window_bounds = array<i64: 8, 4>}, {transform_indices = @transform_5, window_bounds = array<i64: 8, 4>}, {transform_indices = @transform_6, window_bounds = array<i64: 8, 4>}]} {
    %c432 = arith.constant 432 : index
    %c0 = arith.constant 0 : index
    %0 = vector.load %arg2[%c432, %c0] : memref<448x384xbf16, #tpu.memory_space<vmem>>, vector<16x384xbf16>
    %1 = arith.extf %0 : vector<16x384xbf16> to vector<16x384xf32>
    %c512 = arith.constant 512 : index
    %c0_0 = arith.constant 0 : index
    %2 = vector.load %arg3[%c512, %c0_0] : memref<528x128xbf16, #tpu.memory_space<vmem>>, vector<16x128xbf16>
    %3 = arith.extf %2 : vector<16x128xbf16> to vector<16x128xf32>
    %c0_1 = arith.constant 0 : index
    %c0_2 = arith.constant 0 : index
    %4 = vector.load %arg1[%c0_1, %c0_2] : memref<8x48xf32, #tpu.memory_space<vmem>>, vector<8x48xf32>
    %c0_3 = arith.constant 0 : index
    %c0_4 = arith.constant 0 : index
    %5 = vector.load %arg2[%c0_3, %c0_4] : memref<448x384xbf16, #tpu.memory_space<vmem>>, vector<48x384xbf16>
    %6 = vector.extract_strided_slice %1 {offsets = [0, 0], sizes = [1, 384], strides = [1, 1]} : vector<16x384xf32> to vector<1x384xf32>
    %7 = arith.truncf %4 : vector<8x48xf32> to vector<8x48xbf16>
    %cst = arith.constant dense<0.000000e+00> : vector<8x384xf32>
    %8 = tpu.matmul %7, %5, %cst {dimension_numbers = #tpu.dot_dimension_numbers<[1], [0], [0], [1], [0, 0, 1, 1], [], []>} : vector<8x48xbf16>, vector<48x384xbf16>, vector<8x384xf32> -> vector<8x384xf32>
    %9 = vector.broadcast %6 : vector<1x384xf32> to vector<8x384xf32>
    %10 = arith.addf %8, %9 : vector<8x384xf32>
    %cst_5 = arith.constant 0.000000e+00 : f32
    %11 = vector.broadcast %cst_5 : f32 to vector<8x384xf32>
    %12 = arith.cmpf ogt, %10, %11 : vector<8x384xf32>
    %cst_6 = arith.constant 0.000000e+00 : f32
    %13 = vector.broadcast %cst_6 : f32 to vector<8x384xf32>
    %14 = arith.minimumf %10, %13 : vector<8x384xf32>
    %15 = math.exp %14 : vector<8x384xf32>
    %cst_7 = arith.constant 1.000000e+00 : f32
    %16 = vector.broadcast %cst_7 : f32 to vector<8x384xf32>
    %17 = arith.subf %15, %16 : vector<8x384xf32>
    %18 = arith.select %12, %10, %17 : vector<8x384xi1>, vector<8x384xf32>
    %c48 = arith.constant 48 : index
    %c0_8 = arith.constant 0 : index
    %19 = vector.load %arg2[%c48, %c0_8] : memref<448x384xbf16, #tpu.memory_space<vmem>>, vector<384x256xbf16>
    %20 = vector.extract_strided_slice %1 {offsets = [1, 0], sizes = [1, 256], strides = [1, 1]} : vector<16x384xf32> to vector<1x256xf32>
    %21 = arith.truncf %18 : vector<8x384xf32> to vector<8x384xbf16>
    %cst_9 = arith.constant dense<0.000000e+00> : vector<8x256xf32>
    %22 = tpu.matmul %21, %19, %cst_9 {dimension_numbers = #tpu.dot_dimension_numbers<[1], [0], [0], [1], [0, 0, 1, 1], [], []>} : vector<8x384xbf16>, vector<384x256xbf16>, vector<8x256xf32> -> vector<8x256xf32>
    %23 = vector.broadcast %20 : vector<1x256xf32> to vector<8x256xf32>
    %24 = arith.addf %22, %23 : vector<8x256xf32>
    %cst_10 = arith.constant 0.000000e+00 : f32
    %25 = vector.broadcast %cst_10 : f32 to vector<8x256xf32>
    %26 = arith.cmpf ogt, %24, %25 : vector<8x256xf32>
    %cst_11 = arith.constant 0.000000e+00 : f32
    %27 = vector.broadcast %cst_11 : f32 to vector<8x256xf32>
    %28 = arith.minimumf %24, %27 : vector<8x256xf32>
    %29 = math.exp %28 : vector<8x256xf32>
    %cst_12 = arith.constant 1.000000e+00 : f32
    %30 = vector.broadcast %cst_12 : f32 to vector<8x256xf32>
    %31 = arith.subf %29, %30 : vector<8x256xf32>
    %32 = arith.select %26, %24, %31 : vector<8x256xi1>, vector<8x256xf32>
    %c0_13 = arith.constant 0 : index
    %c0_14 = arith.constant 0 : index
    %33 = vector.load %arg3[%c0_13, %c0_14] : memref<528x128xbf16, #tpu.memory_space<vmem>>, vector<256x128xbf16>
    %34 = vector.extract_strided_slice %3 {offsets = [0, 0], sizes = [1, 128], strides = [1, 1]} : vector<16x128xf32> to vector<1x128xf32>
    %35 = arith.truncf %32 : vector<8x256xf32> to vector<8x256xbf16>
    %cst_15 = arith.constant dense<0.000000e+00> : vector<8x128xf32>
    %36 = tpu.matmul %35, %33, %cst_15 {dimension_numbers = #tpu.dot_dimension_numbers<[1], [0], [0], [1], [0, 0, 1, 1], [], []>} : vector<8x256xbf16>, vector<256x128xbf16>, vector<8x128xf32> -> vector<8x128xf32>
    %37 = vector.broadcast %34 : vector<1x128xf32> to vector<8x128xf32>
    %38 = arith.addf %36, %37 : vector<8x128xf32>
    %cst_16 = arith.constant 0.000000e+00 : f32
    %39 = vector.broadcast %cst_16 : f32 to vector<8x128xf32>
    %40 = arith.cmpf ogt, %38, %39 : vector<8x128xf32>
    %cst_17 = arith.constant 0.000000e+00 : f32
    %41 = vector.broadcast %cst_17 : f32 to vector<8x128xf32>
    %42 = arith.minimumf %38, %41 : vector<8x128xf32>
    %43 = math.exp %42 : vector<8x128xf32>
    %cst_18 = arith.constant 1.000000e+00 : f32
    %44 = vector.broadcast %cst_18 : f32 to vector<8x128xf32>
    %45 = arith.subf %43, %44 : vector<8x128xf32>
    %46 = arith.select %40, %38, %45 : vector<8x128xi1>, vector<8x128xf32>
    %c256 = arith.constant 256 : index
    %c0_19 = arith.constant 0 : index
    %47 = vector.load %arg3[%c256, %c0_19] : memref<528x128xbf16, #tpu.memory_space<vmem>>, vector<128x128xbf16>
    %48 = vector.extract_strided_slice %3 {offsets = [1, 0], sizes = [1, 128], strides = [1, 1]} : vector<16x128xf32> to vector<1x128xf32>
    %49 = arith.truncf %46 : vector<8x128xf32> to vector<8x128xbf16>
    %cst_20 = arith.constant dense<0.000000e+00> : vector<8x128xf32>
    %50 = tpu.matmul %49, %47, %cst_20 {dimension_numbers = #tpu.dot_dimension_numbers<[1], [0], [0], [1], [0, 0, 1, 1], [], []>} : vector<8x128xbf16>, vector<128x128xbf16>, vector<8x128xf32> -> vector<8x128xf32>
    %51 = vector.broadcast %48 : vector<1x128xf32> to vector<8x128xf32>
    %52 = arith.addf %50, %51 : vector<8x128xf32>
    %cst_21 = arith.constant 0.000000e+00 : f32
    %53 = vector.broadcast %cst_21 : f32 to vector<8x128xf32>
    %54 = arith.cmpf ogt, %52, %53 : vector<8x128xf32>
    %cst_22 = arith.constant 0.000000e+00 : f32
    %55 = vector.broadcast %cst_22 : f32 to vector<8x128xf32>
    %56 = arith.minimumf %52, %55 : vector<8x128xf32>
    %57 = math.exp %56 : vector<8x128xf32>
    %cst_23 = arith.constant 1.000000e+00 : f32
    %58 = vector.broadcast %cst_23 : f32 to vector<8x128xf32>
    %59 = arith.subf %57, %58 : vector<8x128xf32>
    %60 = arith.select %54, %52, %59 : vector<8x128xi1>, vector<8x128xf32>
    %c384 = arith.constant 384 : index
    %c0_24 = arith.constant 0 : index
    %61 = vector.load %arg3[%c384, %c0_24] : memref<528x128xbf16, #tpu.memory_space<vmem>>, vector<128x128xbf16>
    %62 = vector.extract_strided_slice %3 {offsets = [2, 0], sizes = [1, 128], strides = [1, 1]} : vector<16x128xf32> to vector<1x128xf32>
    %63 = arith.truncf %60 : vector<8x128xf32> to vector<8x128xbf16>
    %cst_25 = arith.constant dense<0.000000e+00> : vector<8x128xf32>
    %64 = tpu.matmul %63, %61, %cst_25 {dimension_numbers = #tpu.dot_dimension_numbers<[1], [0], [0], [1], [0, 0, 1, 1], [], []>} : vector<8x128xbf16>, vector<128x128xbf16>, vector<8x128xf32> -> vector<8x128xf32>
    %65 = vector.broadcast %62 : vector<1x128xf32> to vector<8x128xf32>
    %66 = arith.addf %64, %65 : vector<8x128xf32>
    %c0_26 = arith.constant 0 : index
    %c0_27 = arith.constant 0 : index
    %67 = vector.load %arg4[%c0_26, %c0_27] : memref<8x128xf32, #tpu.memory_space<vmem>>, vector<8x128xf32>
    tpu.vector_store %arg4[%c0_26, %c0_27], %66 {strides = array<i32>} : memref<8x128xf32, #tpu.memory_space<vmem>>, vector<8x128xf32>,
    %68 = vector.extract_strided_slice %66 {offsets = [0, 0], sizes = [8, 4], strides = [1, 1]} : vector<8x128xf32> to vector<8x4xf32>
    %cst_28 = arith.constant 0.000000e+00 : f32
    %69 = vector.broadcast %cst_28 : f32 to vector<8x4xf32>
    %70 = arith.addf %68, %69 : vector<8x4xf32>
    %cst_29 = arith.constant 0.000000e+00 : f32
    %71 = vector.broadcast %cst_29 : f32 to vector<8x4xf32>
    %72 = arith.subf %71, %70 : vector<8x4xf32>
    %73 = math.exp %72 : vector<8x4xf32>
    %cst_30 = arith.constant 1.000000e+00 : f32
    %74 = vector.broadcast %cst_30 : f32 to vector<8x4xf32>
    %75 = arith.addf %74, %73 : vector<8x4xf32>
    %cst_31 = arith.constant 1.000000e+00 : f32
    %76 = vector.broadcast %cst_31 : f32 to vector<8x4xf32>
    %77 = arith.divf %76, %75 : vector<8x4xf32>
    %78 = vector.extract_strided_slice %66 {offsets = [0, 4], sizes = [8, 4], strides = [1, 1]} : vector<8x128xf32> to vector<8x4xf32>
    %cst_32 = arith.constant 0.000000e+00 : f32
    %79 = vector.broadcast %cst_32 : f32 to vector<8x4xf32>
    %80 = arith.maximumf %78, %79 : vector<8x4xf32>
    %81 = math.absf %78 : vector<8x4xf32>
    %cst_33 = arith.constant 0.000000e+00 : f32
    %82 = vector.broadcast %cst_33 : f32 to vector<8x4xf32>
    %83 = arith.subf %82, %81 : vector<8x4xf32>
    %84 = math.exp %83 : vector<8x4xf32>
    %cst_34 = arith.constant 1.000000e+00 : f32
    %85 = vector.broadcast %cst_34 : f32 to vector<8x4xf32>
    %86 = arith.addf %85, %84 : vector<8x4xf32>
    %87 = math.log %86 : vector<8x4xf32>
    %88 = arith.addf %80, %87 : vector<8x4xf32>
    %cst_35 = arith.constant 1.000000e+00 : f32
    %89 = vector.broadcast %cst_35 : f32 to vector<8x4xf32>
    %90 = arith.addf %88, %89 : vector<8x4xf32>
    %cst_36 = arith.constant 5.000000e+00 : f32
    %91 = vector.broadcast %cst_36 : f32 to vector<8x4xf32>
    %92 = arith.mulf %90, %91 : vector<8x4xf32>
    %93 = arith.mulf %77, %92 : vector<8x4xf32>
    %c0_37 = arith.constant 0 : index
    %c0_38 = arith.constant 0 : index
    %94 = vector.load %arg5[%c0_37, %c0_38] : memref<8x4xf32, #tpu.memory_space<vmem>>, vector<8x4xf32>
    tpu.vector_store %arg5[%c0_37, %c0_38], %77 {strides = array<i32>} : memref<8x4xf32, #tpu.memory_space<vmem>>, vector<8x4xf32>,
    %cst_39 = arith.constant 9.99999997E-7 : f32
    %95 = vector.broadcast %cst_39 : f32 to vector<8x4xf32>
    %96 = arith.addf %93, %95 : vector<8x4xf32>
    %c0_40 = arith.constant 0 : index
    %c0_41 = arith.constant 0 : index
    %97 = vector.load %arg6[%c0_40, %c0_41] : memref<8x4xf32, #tpu.memory_space<vmem>>, vector<8x4xf32>
    tpu.vector_store %arg6[%c0_40, %c0_41], %96 {strides = array<i32>} : memref<8x4xf32, #tpu.memory_space<vmem>>, vector<8x4xf32>,
    %98 = arith.subf %92, %93 : vector<8x4xf32>
    %cst_42 = arith.constant 9.99999974E-5 : f32
    %99 = vector.broadcast %cst_42 : f32 to vector<8x4xf32>
    %100 = arith.addf %98, %99 : vector<8x4xf32>
    %c0_43 = arith.constant 0 : index
    %c0_44 = arith.constant 0 : index
    %101 = vector.load %arg7[%c0_43, %c0_44] : memref<8x4xf32, #tpu.memory_space<vmem>>, vector<8x4xf32>
    tpu.vector_store %arg7[%c0_43, %c0_44], %100 {strides = array<i32>} : memref<8x4xf32, #tpu.memory_space<vmem>>, vector<8x4xf32>,
    return
  }
  func.func @transform_0(%arg0: i32) -> (i32, i32) {
    %c0_i32 = arith.constant 0 : i32
    %c0_i32_0 = arith.constant 0 : i32
    return %arg0, %c0_i32 : i32, i32
  }
  func.func @transform_1(%arg0: i32) -> (i32, i32) {
    %c0_i32 = arith.constant 0 : i32
    %c0_i32_0 = arith.constant 0 : i32
    %c0_i32_1 = arith.constant 0 : i32
    return %c0_i32, %c0_i32_0 : i32, i32
  }
  func.func @transform_2(%arg0: i32) -> (i32, i32) {
    %c0_i32 = arith.constant 0 : i32
    %c0_i32_0 = arith.constant 0 : i32
    %c0_i32_1 = arith.constant 0 : i32
    return %c0_i32, %c0_i32_0 : i32, i32
  }
  func.func @transform_3(%arg0: i32) -> (i32, i32) {
    %c0_i32 = arith.constant 0 : i32
    %c0_i32_0 = arith.constant 0 : i32
    return %arg0, %c0_i32 : i32, i32
  }
  func.func @transform_4(%arg0: i32) -> (i32, i32) {
    %c0_i32 = arith.constant 0 : i32
    %c0_i32_0 = arith.constant 0 : i32
    return %arg0, %c0_i32 : i32, i32
  }
  func.func @transform_5(%arg0: i32) -> (i32, i32) {
    %c0_i32 = arith.constant 0 : i32
    %c0_i32_0 = arith.constant 0 : i32
    return %arg0, %c0_i32 : i32, i32
  }
  func.func @transform_6(%arg0: i32) -> (i32, i32) {
    %c0_i32 = arith.constant 0 : i32
    %c0_i32_0 = arith.constant 0 : i32
    return %arg0, %c0_i32 : i32, i32
  }
}

</mosaic_0001>

<bundles_post_ra>
// kernel: ac_forward.1
= control target key start
LH: loop header
LB: loop body
LE: loop exit
PB: predicated region body
PF: predicated region fallthrough
CT: control target
= control target key end

     0   :  { %12 = vsyncpa [#allocation3], 0  ;;  %s1583_s0 = inlined_call_operand.vmem [shape: f32[8,48], index: 0, kind: input, shape index: {}]   ;;  %s1584_s1 = inlined_call_operand.hbm [shape: bf16[448,384], index: 1, kind: input, shape index: {}]   ;;  %s1585_s2 = inlined_call_operand.hbm [shape: bf16[528,128], index: 2, kind: input, shape index: {}]   ;;  %s1586_s3 = inlined_call_operand.vmem [shape: f32[8,128], index: 3, kind: output, shape index: {0}]   ;;  %s1587_s4 = inlined_call_operand.vmem [shape: f32[8,4], index: 4, kind: output, shape index: {1}]   ;;  %s1588_s5 = inlined_call_operand.vmem [shape: f32[8,4], index: 5, kind: output, shape index: {2}]   ;;  %s1589_s6 = inlined_call_operand.vmem [shape: f32[8,4], index: 6, kind: output, shape index: {3}]  }
   0x1   :  { %s20_s23 = sshll.u32 %s1584_s1, 4  ;;  %s21_s23 = int_to_ptr.hbm [resolvable:$true] %s20_s23 }
   0x2   :  { %13 = vsyncpa [#allocation5], 0  ;;  %s1500_s24 = smov [#allocation2]   ;;  %s33_s28 = sshll.u32 %s1585_s2, 4  ;;  %s34_s28 = int_to_ptr.hbm [resolvable:$true] %s33_s28 }
   0x3   :  { %s22_s25 = sshll.u32 %s1500_s24, 4  ;;  %s1501_s29 = smov 192   ;;  %s23_s25 = int_to_ptr.vmem [resolvable:$true] %s22_s25 }
   0x4   :  { %s1502_s30 = smov 12   ;;  %s1503_s7 = smov [#allocation4]  }
   0x5   :  { %28 = dma.hbm_to_vmem [thread:$0]  %s21_s23, 10752, %s23_s25, [#allocation3], %s1501_s29, %s1501_s29, %s1502_s30  }
   0x6   :  { %s35_s8 = sshll.u32 %s1503_s7, 4  ;;  %s1504_s9 = smov 64   ;;  %s36_s8 = int_to_ptr.vmem [resolvable:$true] %s35_s8 }
   0x7   :  { %s1505_s10 = smov 4  }
   0x8   :  { %41 = dma.hbm_to_vmem [thread:$0]  %s34_s28, 4224, %s36_s8, [#allocation5], %s1504_s9, %s1504_s9, %s1505_s10  }
   0x9   :  { %1496 = dma.done.wait [#allocation3], 10752  }
   0xa   :  { %1497 = vsyncadd [#allocation3], 4294956544 }
   0xb   :  { %1498 = dma.done.wait [#allocation5], 4224  }
   0xc   :  { %1499 = vsyncadd [#allocation5], 4294963072  ;;  %v990_v0 = vld [vmem:[#allocation2 + $0x30] sm:$0xf]  ;;  %v1337_v1 = vld [vmem:[#allocation2 + $0x38] sm:$0xf0] }
   0xd   :  { %v978_v2 = vld [vmem:[#allocation2 + $0x18] sm:$0xf]  ;;  %v991_v3 = vor.u32 %v1337_v1, %v990_v0  ;;  %v1334_v4 = vld [vmem:[#allocation2 + $0x20] sm:$0xf0]  ;;  %v986_v8 = vld [vmem:[#allocation2 + $0x20] sm:$0xf] }
   0xe   :  { %v998_v5 = vld [vmem:[#allocation2 + $0x38] sm:$0xf]  ;;  %v1338_v6 = vld [vmem:[#allocation2 + $0x40] sm:$0xf0]  ;;  %v979_v9 = vor.u32 %v1334_v4, %v978_v2  ;;  %v1335_v10 = vld [vmem:[#allocation2 + $0x28] sm:$0xf0] }
   0xf   :  { %v999_v7 = vor.u32 %v1338_v6, %v998_v5  ;;  %132 = vmatpush.bf16.msra.mxu1 %v991_v3  ;;  %v966_v11 = vld [vmem:[#allocation2] sm:$0xf]  ;;  %v1331_v12 = vld [vmem:[#allocation2 + $0x8] sm:$0xf0]  ;;  %v987_v13 = vor.u32 %v1335_v10, %v986_v8  ;;  %v1336_v14 = vld [vmem:[#allocation2 + $0x34] sm:$0xf] }
  0x10   :  { %v992_v15 = vld [vmem:[#allocation2 + $0x3c] sm:$0xf0]  ;;  %v974_v16 = vld [vmem:[#allocation2 + $0x8] sm:$0xf]  ;;  %v1332_v17 = vld [vmem:[#allocation2 + $0x10] sm:$0xf0]  ;;  %v967_v20 = vor.u32 %v1331_v12, %v966_v11 }
  0x11   :  { %158 = vmatpush.bf16.msra.mxu2 %v999_v7  ;;  %v1064_v18 = vld [vmem:[#allocation2 + $0xf0] sm:$0xf]  ;;  %v1354_v19 = vld [vmem:[#allocation2 + $0xf8] sm:$0xf0]  ;;  %v58_v21 = vld [vmem:[%s1583_s0] sm:$0xff]  ;;  %v995_v25 = vor.u32 %v1336_v14, %v992_v15  ;;  %v975_v26 = vor.u32 %v1332_v17, %v974_v16  ;;  %vm123_vm0 = vcmask 392192  }
  0x12   :  { %v1065_v22 = vor.u32 %v1354_v19, %v1064_v18  ;;  %v1056_v23 = vld [vmem:[#allocation2 + $0xd8] sm:$0xf]  ;;  %v1352_v24 = vld [vmem:[#allocation2 + $0xe0] sm:$0xf0]  ;;  %v1333_v27 = vld [vmem:[#allocation2 + $0x1c] sm:$0xf]  ;;  %v71_v33 = vpack.c.bf16 %v58_v21, %v58_v21 }
  0x13   :  { %133 = vmatpush.bf16.msra.mxu1 %v979_v9  ;;  %v980_v28 = vld [vmem:[#allocation2 + $0x24] sm:$0xf0]  ;;  %v1057_v29 = vor.u32 %v1352_v24, %v1056_v23  ;;  %v1048_v30 = vld [vmem:[#allocation2 + $0xc0] sm:$0xf]  ;;  %v1353_v31 = vld [vmem:[#allocation2 + $0xf4] sm:$0xf] }
  0x14   :  { %477 = vmatpush.bf16.msra.mxu3 %v1065_v22  ;;  %v1066_v32 = vld [vmem:[#allocation2 + $0xfc] sm:$0xf0]  ;;  %v1350_v34 = vld [vmem:[#allocation2 + $0xc8] sm:$0xf0]  ;;  %v1128_v36 = vld [vmem:[#allocation2 + $0x1b0] sm:$0xf]  ;;  %v983_v41 = vor.u32 %v1333_v27, %v980_v28 }
  0x15   :  { %159 = vmatpush.bf16.msra.mxu2 %v987_v13  ;;  %v1069_v35 = vor.u32 %v1353_v31, %v1066_v32  ;;  %v1370_v37 = vld [vmem:[#allocation2 + $0x1b8] sm:$0xf0]  ;;  %v1058_v40 = vld [vmem:[#allocation2 + $0xe4] sm:$0xf0]  ;;  %v1330_v42 = vld [vmem:[#allocation2 + $0x4] sm:$0xf]  ;;  %v1049_v46 = vor.u32 %v1350_v34, %v1048_v30 }
  0x16   :  { %v1129_v38 = vor.u32 %v1370_v37, %v1128_v36  ;;  %v1351_v39 = vld [vmem:[#allocation2 + $0xdc] sm:$0xf]  ;;  %v1120_v43 = vld [vmem:[#allocation2 + $0x198] sm:$0xf]  ;;  %v1368_v44 = vld [vmem:[#allocation2 + $0x1a0] sm:$0xf0] }
  0x17   :  { %134 = vmatpush.bf16.msra.mxu1 %v967_v20  ;;  %v968_v45 = vld [vmem:[#allocation2 + $0xc] sm:$0xf0]  ;;  %v1040_v47 = vld [vmem:[#allocation2 + $0xa8] sm:$0xf]  ;;  %v1348_v48 = vld [vmem:[#allocation2 + $0xb0] sm:$0xf0]  ;;  %v1061_v49 = vor.u32 %v1351_v39, %v1058_v40  ;;  %v1121_v50 = vor.u32 %v1368_v44, %v1120_v43 }
  0x18   :  { %478 = vmatpush.bf16.msra.mxu3 %v1057_v29  ;;  %490 = vmatpush.bf16.msra.mxu0 %v1129_v38  ;;  %v1349_v51 = vld [vmem:[#allocation2 + $0xc4] sm:$0xf]  ;;  %v1050_v52 = vld [vmem:[#allocation2 + $0xcc] sm:$0xf0]  ;;  %v1112_v53 = vld [vmem:[#allocation2 + $0x180] sm:$0xf]  ;;  %v971_v57 = vor.u32 %v1330_v42, %v968_v45  ;;  %v1041_v58 = vor.u32 %v1348_v48, %v1040_v47 }
  0x19   :  { %160 = vmatpush.bf16.msra.mxu2 %v975_v26  ;;  %v1366_v54 = vld [vmem:[#allocation2 + $0x188] sm:$0xf0]  ;;  %v1192_v55 = vld [vmem:[#allocation2 + $0x270] sm:$0xf]  ;;  %v1386_v56 = vld [vmem:[#allocation2 + $0x278] sm:$0xf0]  ;;  %v1053_v59 = vor.u32 %v1349_v51, %v1050_v52 }
  0x1a   :  { %1000 = vmatmul.msk.bf16.vlgmr.msra.gmra.mxu1 %vm123_vm0, %v71_v33  ;;  %v1032_v60 = vld [vmem:[#allocation2 + $0x90] sm:$0xf]  ;;  %v1346_v61 = vld [vmem:[#allocation2 + $0x98] sm:$0xf0]  ;;  %v1113_v62 = vor.u32 %v1366_v54, %v1112_v53  ;;  %v1193_v63 = vor.u32 %v1386_v56, %v1192_v55  ;;  %v1024_v1 = vld [vmem:[#allocation2 + $0x78] sm:$0xf] }
  0x1b   :  { %145 = vmatpush.bf16.msrb.mxu1 %v995_v25  ;;  %v1033_v0 = vor.u32 %v1346_v61, %v1032_v60  ;;  %v1344_v2 = vld [vmem:[#allocation2 + $0x80] sm:$0xf0]  ;;  %v1016_v4 = vld [vmem:[#allocation2 + $0x60] sm:$0xf]  ;;  %v1342_v5 = vld [vmem:[#allocation2 + $0x68] sm:$0xf0] }
  0x1c   :  { %1002 = vmatmul.msk.bf16.vlgmr.msra.gmra.mxu2 %vm123_vm0, %v71_v33  ;;  %479 = vmatpush.bf16.msra.mxu3 %v1049_v46  ;;  %v1025_v3 = vor.u32 %v1344_v2, %v1024_v1  ;;  %v1017_v6 = vor.u32 %v1342_v5, %v1016_v4  ;;  %v1347_v7 = vld [vmem:[#allocation2 + $0xac] sm:$0xf]  ;;  %v1042_v8 = vld [vmem:[#allocation2 + $0xb4] sm:$0xf0]  ;;  %v1008_v10 = vld [vmem:[#allocation2 + $0x48] sm:$0xf] }
  0x1d   :  { %516 = vmatpush.bf16.msrb.mxu2 %v1069_v35  ;;  %491 = vmatpush.bf16.msra.mxu0 %v1121_v50  ;;  %v1045_v9 = vor.u32 %v1347_v7, %v1042_v8  ;;  %v1340_v11 = vld [vmem:[#allocation2 + $0x50] sm:$0xf0]  ;;  %v1104_v12 = vld [vmem:[#allocation2 + $0x168] sm:$0xf]  ;;  %v1184_v15 = vld [vmem:[#allocation2 + $0x258] sm:$0xf] }
  0x1e   :  { %v1009_v13 = vor.u32 %v1340_v11, %v1008_v10  ;;  %v1364_v14 = vld [vmem:[#allocation2 + $0x170] sm:$0xf0]  ;;  %v1384_v16 = vld [vmem:[#allocation2 + $0x260] sm:$0xf0]  ;;  %v1034_v20 = vld [vmem:[#allocation2 + $0x9c] sm:$0xf0] }
  0x1f   :  { %146 = vmatpush.bf16.msrb.mxu1 %v983_v41  ;;  %v1105_v17 = vor.u32 %v1364_v14, %v1104_v12  ;;  %v1185_v18 = vor.u32 %v1384_v16, %v1184_v15  ;;  %v1345_v19 = vld [vmem:[#allocation2 + $0x94] sm:$0xf]  ;;  %v1130_v23 = vld [vmem:[#allocation2 + $0x1bc] sm:$0xf0]  ;;  %v1096_v25 = vld [vmem:[#allocation2 + $0x150] sm:$0xf] }
  0x20   :  { %480 = vmatpush.bf16.msra.mxu3 %v1041_v58  ;;  %v1369_v21 = vld [vmem:[#allocation2 + $0x1b4] sm:$0xf]  ;;  %v1037_v22 = vor.u32 %v1345_v19, %v1034_v20  ;;  %v1362_v26 = vld [vmem:[#allocation2 + $0x158] sm:$0xf0]  ;;  %v1176_v27 = vld [vmem:[#allocation2 + $0x240] sm:$0xf] }
  0x21   :  { %517 = vmatpush.bf16.msrb.mxu2 %v1061_v49  ;;  %492 = vmatpush.bf16.msra.mxu0 %v1113_v62  ;;  %v1133_v24 = vor.u32 %v1369_v21, %v1130_v23  ;;  %v1097_v28 = vor.u32 %v1362_v26, %v1096_v25  ;;  %v1382_v29 = vld [vmem:[#allocation2 + $0x248] sm:$0xf0]  ;;  %v1343_v30 = vld [vmem:[#allocation2 + $0x7c] sm:$0xf]  ;;  %v1026_v31 = vld [vmem:[#allocation2 + $0x84] sm:$0xf0] }
  0x22   :  { %v1177_v32 = vor.u32 %v1382_v29, %v1176_v27  ;;  %v1367_v34 = vld [vmem:[#allocation2 + $0x19c] sm:$0xf]  ;;  %v1122_v35 = vld [vmem:[#allocation2 + $0x1a4] sm:$0xf0]  ;;  %v1088_v37 = vld [vmem:[#allocation2 + $0x138] sm:$0xf] }
  0x23   :  { %147 = vmatpush.bf16.msrb.mxu1 %v971_v57  ;;  %v1125_v36 = vor.u32 %v1367_v34, %v1122_v35  ;;  %v1360_v38 = vld [vmem:[#allocation2 + $0x140] sm:$0xf0]  ;;  %v1168_v39 = vld [vmem:[#allocation2 + $0x228] sm:$0xf]  ;;  %v1380_v41 = vld [vmem:[#allocation2 + $0x230] sm:$0xf0] }
  0x24   :  { %481 = vmatpush.bf16.msra.mxu3 %v1033_v0  ;;  %v1089_v40 = vor.u32 %v1360_v38, %v1088_v37  ;;  %v1341_v42 = vld [vmem:[#allocation2 + $0x64] sm:$0xf]  ;;  %v1018_v43 = vld [vmem:[#allocation2 + $0x6c] sm:$0xf0]  ;;  %v1169_v44 = vor.u32 %v1380_v41, %v1168_v39  ;;  %v1080_v49 = vld [vmem:[#allocation2 + $0x120] sm:$0xf] }
  0x25   :  { %518 = vmatpush.bf16.msrb.mxu2 %v1053_v59  ;;  %493 = vmatpush.bf16.msra.mxu0 %v1105_v17  ;;  %v1021_v45 = vor.u32 %v1341_v42, %v1018_v43  ;;  %v1365_v46 = vld [vmem:[#allocation2 + $0x184] sm:$0xf]  ;;  %v1114_v47 = vld [vmem:[#allocation2 + $0x18c] sm:$0xf0]  ;;  %v1358_v50 = vld [vmem:[#allocation2 + $0x128] sm:$0xf0] }
  0x26   :  { %v1117_v48 = vor.u32 %v1365_v46, %v1114_v47  ;;  %v1160_v51 = vld [vmem:[#allocation2 + $0x210] sm:$0xf]  ;;  %v1081_v52 = vor.u32 %v1358_v50, %v1080_v49  ;;  %v1378_v53 = vld [vmem:[#allocation2 + $0x218] sm:$0xf0]  ;;  %v1339_v54 = vld [vmem:[#allocation2 + $0x4c] sm:$0xf] }
  0x27   :  { %503 = vmatpush.bf16.msra.mxu1 %v1193_v63  ;;  %v1010_v55 = vld [vmem:[#allocation2 + $0x54] sm:$0xf0]  ;;  %v1161_v56 = vor.u32 %v1378_v53, %v1160_v51  ;;  %v1363_v58 = vld [vmem:[#allocation2 + $0x16c] sm:$0xf]  ;;  %v1072_v61 = vld [vmem:[#allocation2 + $0x108] sm:$0xf] }
  0x28   :  { %482 = vmatpush.bf16.msra.mxu3 %v1025_v3  ;;  %v1013_v57 = vor.u32 %v1339_v54, %v1010_v55  ;;  %v1106_v59 = vld [vmem:[#allocation2 + $0x174] sm:$0xf0]  ;;  %v1356_v62 = vld [vmem:[#allocation2 + $0x110] sm:$0xf0]  ;;  %v1376_v1 = vld [vmem:[#allocation2 + $0x200] sm:$0xf0] }
  0x29   :  { %519 = vmatpush.bf16.msrb.mxu2 %v1045_v9  ;;  %494 = vmatpush.bf16.msra.mxu0 %v1097_v28  ;;  %v1109_v60 = vor.u32 %v1363_v58, %v1106_v59  ;;  %v1152_v63 = vld [vmem:[#allocation2 + $0x1f8] sm:$0xf]  ;;  %v1073_v0 = vor.u32 %v1356_v62, %v1072_v61  ;;  %v1361_v2 = vld [vmem:[#allocation2 + $0x154] sm:$0xf]  ;;  %v1098_v3 = vld [vmem:[#allocation2 + $0x15c] sm:$0xf0] }
  0x2a   :  { %1001 = vmatmul.msk.bf16.vlgmr.msrb.gmra.mxu1 %vm123_vm0, %v71_v33  ;;  %v1029_v33 = vor.u32 %v1343_v30, %v1026_v31  ;;  %v1153_v4 = vor.u32 %v1376_v1, %v1152_v63  ;;  %v1101_v5 = vor.u32 %v1361_v2, %v1098_v3  ;;  %v1194_v7 = vld [vmem:[#allocation2 + $0x27c] sm:$0xf0]  ;;  %v1374_v10 = vld [vmem:[#allocation2 + $0x1e8] sm:$0xf0]  ;;  %v1359_v12 = vld [vmem:[#allocation2 + $0x13c] sm:$0xf] }
  0x2b   :  { %504 = vmatpush.bf16.msra.mxu1 %v1185_v18  ;;  %v1144_v9 = vld [vmem:[#allocation2 + $0x1e0] sm:$0xf]  ;;  %v1383_v14 = vld [vmem:[#allocation2 + $0x25c] sm:$0xf]  ;;  %v1555_v15 = vld [vmem:[#allocation2 + $0x288] sm:$0xff]  ;;  %vm931_vm10 = vcmask 31744  }
  0x2c   :  { %483 = vmatpush.bf16.msra.mxu3 %v1017_v6  ;;  %v1385_v6 = vld [vmem:[#allocation2 + $0x274] sm:$0xf]  ;;  %v1145_v11 = vor.u32 %v1374_v10, %v1144_v9  ;;  %v1186_v17 = vld [vmem:[#allocation2 + $0x264] sm:$0xf0]  ;;  %v1357_v21 = vld [vmem:[#allocation2 + $0x124] sm:$0xf]  ;;  %v54_v54 = vunpack.c.h.bf16 %v1555_v15 }
  0x2d   :  { %520 = vmatpush.bf16.msrb.mxu2 %v1037_v22  ;;  %495 = vmatpush.bf16.msra.mxu0 %v1089_v40  ;;  %v1197_v8 = vor.u32 %v1385_v6, %v1194_v7  ;;  %v1189_v18 = vor.u32 %v1383_v14, %v1186_v17  ;;  %v1136_v19 = vld [vmem:[#allocation2 + $0x1c8] sm:$0xf]  ;;  %v1372_v20 = vld [vmem:[#allocation2 + $0x1d0] sm:$0xf0]  ;;  %v53_v22 = vunpack.c.l.bf16 %v1555_v15  ;;  %v1381_v25 = vld [vmem:[#allocation2 + $0x244] sm:$0xf] }
  0x2e   :  { %v1137_v23 = vor.u32 %v1372_v20, %v1136_v19  ;;  %v1178_v26 = vld [vmem:[#allocation2 + $0x24c] sm:$0xf0]  ;;  %v1379_v29 = vld [vmem:[#allocation2 + $0x22c] sm:$0xf]  ;;  %v1074_v31 = vld [vmem:[#allocation2 + $0x114] sm:$0xf0] }
  0x2f   :  { %505 = vmatpush.bf16.msra.mxu1 %v1177_v32  ;;  %v1181_v28 = vor.u32 %v1381_v25, %v1178_v26  ;;  %v1355_v30 = vld [vmem:[#allocation2 + $0x10c] sm:$0xf]  ;;  %v1170_v32 = vld [vmem:[#allocation2 + $0x234] sm:$0xf0]  ;;  %v52_v34 = vld [vmem:[#allocation2 + $0x290] sm:$0xf] }
  0x30   :  { %484 = vmatpush.bf16.msra.mxu3 %v1009_v13  ;;  %v1090_v13 = vld [vmem:[#allocation2 + $0x144] sm:$0xf0]  ;;  %v1173_v35 = vor.u32 %v1379_v29, %v1170_v32  ;;  %v55_v38 = vunpack.c.l.bf16 %v52_v34  ;;  %v1377_v40 = vld [vmem:[#allocation2 + $0x214] sm:$0xf]  ;;  %v1162_v41 = vld [vmem:[#allocation2 + $0x21c] sm:$0xf0] }
  0x31   :  { %521 = vmatpush.bf16.msrb.mxu2 %v1029_v33  ;;  %496 = vmatpush.bf16.msra.mxu0 %v1081_v52  ;;  %v1093_v16 = vor.u32 %v1359_v12, %v1090_v13  ;;  %v72_v33 = vperm.slane %v53_v22, 0  ;;  %v1165_v42 = vor.u32 %v1377_v40, %v1162_v41  ;;  %v1373_v49 = vld [vmem:[#allocation2 + $0x1e4] sm:$0xf]  ;;  %v1146_v50 = vld [vmem:[#allocation2 + $0x1ec] sm:$0xf0]  ;;  %v73_v61 = vperm.slane %v54_v54, 0 }
  0x32   :  { %v74_v46 = vperm.slane %v55_v38, 0  ;;  %v1149_v55 = vor.u32 %v1373_v49, %v1146_v50  ;;  %v1138_v58 = vld [vmem:[#allocation2 + $0x1d4] sm:$0xf0]  ;;  %v1392_v19 = vld [vmem:[#allocation4 + $0x28] sm:$0xff]  ;;  %v1391_v20 = vld [vmem:[#allocation4 + $0x20] sm:$0xff]  ;;  %v236_v49 = vperm.slane %v54_v54, 1 }
  0x33   :  { %506 = vmatpush.bf16.msra.mxu1 %v1169_v44  ;;  %v1375_v44 = vld [vmem:[#allocation2 + $0x1fc] sm:$0xf]  ;;  %v1389_v25 = vld [vmem:[#allocation4 + $0x10] sm:$0xff]  ;;  %v1400_v26 = vld [vmem:[#allocation4 + $0x68] sm:$0xff] }
  0x34   :  { %529 = vmatpush.bf16.msrb.mxu3 %v1133_v24  ;;  %v1082_v24 = vld [vmem:[#allocation2 + $0x12c] sm:$0xf0]  ;;  %v1394_v17 = vld [vmem:[#allocation4 + $0x38] sm:$0xff]  ;;  %v1387_v29 = vld [vmem:[#allocation4] sm:$0xff] }
  0x35   :  { %522 = vmatpush.bf16.msrb.mxu2 %v1021_v45  ;;  %497 = vmatpush.bf16.msra.mxu0 %v1073_v0  ;;  %v1085_v27 = vor.u32 %v1357_v21, %v1082_v24  ;;  %v1154_v45 = vld [vmem:[#allocation2 + $0x204] sm:$0xf0]  ;;  %v1402_v21 = vld [vmem:[#allocation4 + $0x78] sm:$0xff]  ;;  %v1401_v24 = vld [vmem:[#allocation4 + $0x70] sm:$0xff] }
  0x37   :  { %507 = vmatpush.bf16.msra.mxu1 %v1161_v56 }
  0x38   :  { %530 = vmatpush.bf16.msrb.mxu3 %v1125_v36  ;;  %v1077_v36 = vor.u32 %v1355_v30, %v1074_v31  ;;  %v1398_v30 = vld [vmem:[#allocation4 + $0x58] sm:$0xff] }
  0x39   :  { %523 = vmatpush.bf16.msrb.mxu2 %v1013_v57  ;;  %542 = vmatpush.bf16.msrb.mxu0 %v1197_v8  ;;  %v1371_v57 = vld [vmem:[#allocation2 + $0x1cc] sm:$0xf] }
  0x3a   :  { %v1141_v62 = vor.u32 %v1371_v57, %v1138_v58 }
  0x3b   :  { %508 = vmatpush.bf16.msra.mxu1 %v1153_v4 }
  0x3c   :  { %531 = vmatpush.bf16.msrb.mxu3 %v1117_v48  ;;  %v1157_v48 = vor.u32 %v1375_v44, %v1154_v45 }
  0x3d   :  { %543 = vmatpush.bf16.msrb.mxu0 %v1189_v18  ;;  %v1393_v18 = vld [vmem:[#allocation4 + $0x30] sm:$0xff]  ;;  %711 = vmatpush.bf16.msra.mxu2 %v1402_v21 }
  0x3f   :  { %509 = vmatpush.bf16.msra.mxu1 %v1145_v11 }
  0x40   :  { %532 = vmatpush.bf16.msrb.mxu3 %v1109_v60 }
  0x41   :  { %544 = vmatpush.bf16.msrb.mxu0 %v1181_v28  ;;  %712 = vmatpush.bf16.msra.mxu2 %v1401_v24  ;;  %v1399_v28 = vld [vmem:[#allocation4 + $0x60] sm:$0xff] }
  0x43   :  { %510 = vmatpush.bf16.msra.mxu1 %v1137_v23  ;;  %v1390_v23 = vld [vmem:[#allocation4 + $0x18] sm:$0xff] }
  0x44   :  { %533 = vmatpush.bf16.msrb.mxu3 %v1101_v5 }
  0x45   :  { %545 = vmatpush.bf16.msrb.mxu0 %v1173_v35  ;;  %713 = vmatpush.bf16.msra.mxu2 %v1400_v26  ;;  %v1396_v35 = vld [vmem:[#allocation4 + $0x48] sm:$0xff] }
  0x47   :  { %698 = vmatpush.bf16.msrb.mxu1 %v1394_v17 }
  0x48   :  { %534 = vmatpush.bf16.msrb.mxu3 %v1093_v16 }
  0x49   :  { %546 = vmatpush.bf16.msrb.mxu0 %v1165_v42  ;;  %714 = vmatpush.bf16.msra.mxu2 %v1399_v28  ;;  %v1415_v28 = vld [vmem:[#allocation4 + $0xe0] sm:$0xff] }
  0x4b   :  { %699 = vmatpush.bf16.msrb.mxu1 %v1393_v18 }
  0x4c   :  { %535 = vmatpush.bf16.msrb.mxu3 %v1085_v27  ;;  %v1388_v27 = vld [vmem:[#allocation4 + $0x8] sm:$0xff] }
  0x4d   :  { %547 = vmatpush.bf16.msrb.mxu0 %v1157_v48  ;;  %715 = vmatpush.bf16.msra.mxu2 %v1398_v30  ;;  %v1413_v30 = vld [vmem:[#allocation4 + $0xd0] sm:$0xff] }
  0x4f   :  { %700 = vmatpush.bf16.msrb.mxu1 %v1392_v19 }
  0x50   :  { %536 = vmatpush.bf16.msrb.mxu3 %v1077_v36  ;;  %v235_v36 = vperm.slane %v53_v22, 1 }
  0x51   :  { %548 = vmatpush.bf16.msrb.mxu0 %v1149_v55 }
  0x53   :  { %701 = vmatpush.bf16.msrb.mxu1 %v1391_v20 }
  0x55   :  { %549 = vmatpush.bf16.msrb.mxu0 %v1141_v62 }
  0x57   :  { %702 = vmatpush.bf16.msrb.mxu1 %v1390_v23 }
  0x5b   :  { %703 = vmatpush.bf16.msrb.mxu1 %v1389_v25 }
  0x5f   :  { %704 = vmatpush.bf16.msrb.mxu1 %v1388_v27 }
  0x63   :  { %705 = vmatpush.bf16.msrb.mxu1 %v1387_v29  ;;  %v1414_v29 = vld [vmem:[#allocation4 + $0xd8] sm:$0xff] }
  0x97   :  { %v136_v37 = vpop.f32.mrf.mxu1 }
  0x98   :  { %v137_v39 = vadd.f32 %v136_v37, %v72_v33  ;;  %v1397_v33 = vld [vmem:[#allocation4 + $0x50] sm:$0xff] }
  0x99   :  { %716 = vmatpush.bf16.msra.mxu2 %v1397_v33 }
  0x9a   :  { %v169_v43 = vmin.f32 %v137_v39, 0.0  ;;  %vm166_vm1 = vcmp.gt.f32.partialorder %v137_v39, 0.0 }
  0x9c   :  { %v172_v47 = vmul.f32 1.442695, %v169_v43 }
  0x9d   :  { %717 = vmatpush.bf16.msra.mxu2 %v1396_v35 }
  0x9e   :  { %1426 = vpow2.f32 %v172_v47 }
  0x9f   :  { %v162_v51 = vpop.f32.mrf.mxu2  ;;  %v138_v52 = vpop.f32.mrf.mxu1 }
  0xa0   :  { %v163_v53 = vadd.f32 %v162_v51, %v74_v46 }
  0xa2   :  { %v171_v56 = vmin.f32 %v163_v53, 0.0  ;;  %vm168_vm2 = vcmp.gt.f32.partialorder %v163_v53, 0.0 }
  0xa4   :  { %v176_v59 = vmul.f32 1.442695, %v171_v56  ;;  %v1427_v60 = vpop.eup %1426 }
  0xa5   :  { %v1003_v63 = vadd.f32 -1.0, %v1427_v60 }
  0xa6   :  { %1428 = vpow2.f32 %v176_v59 }
  0xa7   :  { %v164_v0 = vpop.f32.mrf.mxu2  ;;  %v149_v1 = vpop.f32.mrf.mxu1  ;;  %v181_v2 = vsel %vm166_vm1, %v137_v39, %v1003_v63  ;;  %v1395_v39 = vld [vmem:[#allocation4 + $0x40] sm:$0xff] }
  0xa8   :  { %v150_v3 = vadd.f32 %v149_v1, %v73_v61  ;;  %v232_v4 = vpack.c.bf16 %v181_v2, %v181_v2  ;;  %718 = vmatpush.bf16.msra.mxu2 %v1395_v39  ;;  %v1410_v0 = vld [vmem:[#allocation4 + $0xb8] sm:$0xff]  ;;  %v1409_v1 = vld [vmem:[#allocation4 + $0xb0] sm:$0xff]  ;;  %v1408_v2 = vld [vmem:[#allocation4 + $0xa8] sm:$0xff] }
  0xaa   :  { %v170_v5 = vmin.f32 %v150_v3, 0.0  ;;  %485 = vmatmul.bf16.vlgmr.msra.gmra.mxu3 %v232_v4  ;;  %524 = vmatmul.bf16.vlgmr.msrb.gmra.mxu2 %v232_v4  ;;  %vm167_vm3 = vcmp.gt.f32.partialorder %v150_v3, 0.0  ;;  %v1406_v4 = vld [vmem:[#allocation4 + $0x98] sm:$0xff] }
  0xab   :  { %796 = vmatpush.bf16.msra.mxu3 %v1410_v0 }
  0xac   :  { %v1429_v6 = vpop.eup %1428  ;;  %v174_v8 = vmul.f32 1.442695, %v170_v5  ;;  %v1405_v5 = vld [vmem:[#allocation4 + $0x90] sm:$0xff] }
  0xad   :  { %v1005_v7 = vadd.f32 -1.0, %v1429_v6  ;;  %v1404_v6 = vld [vmem:[#allocation4 + $0x88] sm:$0xff] }
  0xae   :  { %1430 = vpow2.f32 %v174_v8  ;;  %v1403_v8 = vld [vmem:[#allocation4 + $0x80] sm:$0xff] }
  0xaf   :  { %v183_v9 = vsel %vm168_vm2, %v163_v53, %v1005_v7  ;;  %v151_v11 = vpop.f32.mrf.mxu1  ;;  %797 = vmatpush.bf16.msra.mxu3 %v1409_v1 }
  0xb0   :  { %v234_v10 = vpack.c.bf16 %v183_v9, %v183_v9  ;;  %v1418_v9 = vld [vmem:[#allocation4 + $0xf8] sm:$0xff] }
  0xb2   :  { %511 = vmatmul.bf16.vlgmr.msra.gmra.mxu1 %v234_v10 }
  0xb3   :  { %798 = vmatpush.bf16.msra.mxu3 %v1408_v2 }
  0xb4   :  { %v1431_v12 = vpop.eup %1430 }
  0xb5   :  { %v1004_v13 = vadd.f32 -1.0, %v1431_v12  ;;  %v1417_v12 = vld [vmem:[#allocation4 + $0xf0] sm:$0xff] }
  0xb7   :  { %v182_v14 = vsel %vm167_vm3, %v150_v3, %v1004_v13  ;;  %v1407_v3 = vld [vmem:[#allocation4 + $0xa0] sm:$0xff] }
  0xb8   :  { %v233_v16 = vpack.c.bf16 %v182_v14, %v182_v14  ;;  %799 = vmatpush.bf16.msra.mxu3 %v1407_v3  ;;  %v1416_v14 = vld [vmem:[#allocation4 + $0xe8] sm:$0xff] }
  0xba   :  { %498 = vmatmul.bf16.vlgmr.msra.gmra.mxu0 %v233_v16  ;;  %537 = vmatmul.bf16.vlgmr.msrb.gmra.mxu3 %v233_v16 }
  0xbb   :  { %881 = vmatpush.bf16.msra.mxu0 %v1418_v9 }
  0xbc   :  { %800 = vmatpush.bf16.msra.mxu3 %v1406_v4 }
  0xbf   :  { %882 = vmatpush.bf16.msra.mxu0 %v1417_v12 }
  0xc0   :  { %801 = vmatpush.bf16.msra.mxu3 %v1405_v5 }
  0xc3   :  { %883 = vmatpush.bf16.msra.mxu0 %v1416_v14 }
  0xc4   :  { %802 = vmatpush.bf16.msra.mxu3 %v1404_v6 }
  0xc7   :  { %884 = vmatpush.bf16.msra.mxu0 %v1415_v28 }
  0xc8   :  { %803 = vmatpush.bf16.msra.mxu3 %v1403_v8 }
  0xca   :  { %550 = vmatmul.bf16.vlgmr.msrb.gmra.mxu0 %v234_v10  ;;  %v56_v10 = vld [vmem:[#allocation4 + $0x100] sm:$0xf] }
  0xcb   :  { %v57_v13 = vunpack.c.l.bf16 %v56_v10  ;;  %885 = vmatpush.bf16.msra.mxu0 %v1414_v29 }
  0xcd   :  { %v601_v16 = vperm.slane %v57_v13, 0  ;;  %v747_v33 = vperm.slane %v57_v13, 1 }
  0xcf   :  { %886 = vmatpush.bf16.msra.mxu0 %v1413_v30 }
 0x12d   :  { %v486_v31 = vpop.f32.mrf.mxu3  ;;  %v525_v32 = vpop.f32.mrf.mxu2 }
 0x12e   :  { %v487_v40 = vadd.f32 %v486_v31, %v235_v36  ;;  %v526_v50 = vadd.f32 %v525_v32, %v236_v49  ;;  %v1412_v31 = vld [vmem:[#allocation4 + $0xc8] sm:$0xff]  ;;  %v1411_v32 = vld [vmem:[#allocation4 + $0xc0] sm:$0xff] }
 0x12f   :  { %v512_v34 = vpop.f32.mrf.mxu1  ;;  %887 = vmatpush.bf16.msra.mxu0 %v1412_v31 }
 0x133   :  { %888 = vmatpush.bf16.msra.mxu0 %v1411_v32 }
 0x135   :  { %v488_v37 = vpop.f32.mrf.mxu3  ;;  %v527_v38 = vpop.f32.mrf.mxu2 }
 0x137   :  { %v514_v41 = vpop.f32.mrf.mxu1  ;;  %v499_v42 = vpop.f32.mrf.mxu0 }
 0x138   :  { %v500_v43 = vadd.f32 %v499_v42, %v487_v40 }
 0x13a   :  { %v513_v44 = vadd.f32 %v512_v34, %v500_v43  ;;  %v832_v43 = vperm.slane %v57_v13, 2 }
 0x13c   :  { %v557_v45 = vmin.f32 %v513_v44, 0.0  ;;  %vm555_vm4 = vcmp.gt.f32.partialorder %v513_v44, 0.0 }
 0x13d   :  { %v538_v46 = vpop.f32.mrf.mxu3 }
 0x13e   :  { %v559_v47 = vmul.f32 1.442695, %v557_v45  ;;  %v539_v52 = vadd.f32 %v538_v46, %v526_v50 }
 0x13f   :  { %v501_v48 = vpop.f32.mrf.mxu0 }
 0x140   :  { %1432 = vpow2.f32 %v559_v47 }
 0x145   :  { %v540_v22 = vpop.f32.mrf.mxu3 }
 0x146   :  { %v1433_v51 = vpop.eup %1432 }
 0x147   :  { %v1198_v53 = vadd.f32 -1.0, %v1433_v51  ;;  %v551_v55 = vpop.f32.mrf.mxu0 }
 0x148   :  { %v552_v56 = vadd.f32 %v551_v55, %v539_v52 }
 0x149   :  { %v565_v57 = vsel %vm555_vm4, %v513_v44, %v1198_v53 }
 0x14a   :  { %v599_v58 = vpack.c.bf16 %v565_v57, %v565_v57  ;;  %v558_v59 = vmin.f32 %v552_v56, 0.0  ;;  %vm556_vm5 = vcmp.gt.f32.partialorder %v552_v56, 0.0 }
 0x14c   :  { %v561_v60 = vmul.f32 1.442695, %v558_v59  ;;  %706 = vmatmul.bf16.vlgmr.msrb.gmra.mxu1 %v599_v58 }
 0x14e   :  { %1434 = vpow2.f32 %v561_v60 }
 0x14f   :  { %v553_v61 = vpop.f32.mrf.mxu0 }
 0x154   :  { %v1435_v62 = vpop.eup %1434 }
 0x155   :  { %v1199_v63 = vadd.f32 -1.0, %v1435_v62 }
 0x157   :  { %v566_v15 = vsel %vm556_vm5, %v552_v56, %v1199_v63 }
 0x158   :  { %v600_v54 = vpack.c.bf16 %v566_v15, %v566_v15 }
 0x15a   :  { %719 = vmatmul.bf16.vlgmr.msra.gmra.mxu2 %v600_v54 }
 0x1c9   :  { %v707_v7 = vpop.f32.mrf.mxu1 }
 0x1ca   :  { %v708_v17 = vadd.f32 %v707_v7, %v601_v16 }
 0x1d1   :  { %v709_v11 = vpop.f32.mrf.mxu1 }
 0x1dd   :  { %v720_v18 = vpop.f32.mrf.mxu2 }
 0x1de   :  { %v721_v19 = vadd.f32 %v720_v18, %v708_v17 }
 0x1e0   :  { %v725_v20 = vmin.f32 %v721_v19, 0.0  ;;  %vm724_vm6 = vcmp.gt.f32.partialorder %v721_v19, 0.0 }
 0x1e2   :  { %v726_v21 = vmul.f32 1.442695, %v725_v20 }
 0x1e4   :  { %1436 = vpow2.f32 %v726_v21 }
 0x1e5   :  { %v722_v23 = vpop.f32.mrf.mxu2 }
 0x1ea   :  { %v1437_v24 = vpop.eup %1436 }
 0x1eb   :  { %v1264_v25 = vadd.f32 -1.0, %v1437_v24 }
 0x1ed   :  { %v729_v26 = vsel %vm724_vm6, %v721_v19, %v1264_v25 }
 0x1ee   :  { %v746_v27 = vpack.c.bf16 %v729_v26, %v729_v26 }
 0x1f0   :  { %804 = vmatmul.bf16.vlgmr.msra.gmra.mxu3 %v746_v27 }
 0x273   :  { %v805_v34 = vpop.f32.mrf.mxu3 }
 0x274   :  { %v806_v35 = vadd.f32 %v805_v34, %v747_v33 }
 0x276   :  { %v810_v36 = vmin.f32 %v806_v35, 0.0  ;;  %vm809_vm7 = vcmp.gt.f32.partialorder %v806_v35, 0.0 }
 0x278   :  { %v811_v37 = vmul.f32 1.442695, %v810_v36 }
 0x27a   :  { %1438 = vpow2.f32 %v811_v37 }
 0x27b   :  { %v807_v38 = vpop.f32.mrf.mxu3 }
 0x280   :  { %v1439_v39 = vpop.eup %1438 }
 0x281   :  { %v1297_v40 = vadd.f32 -1.0, %v1439_v39 }
 0x283   :  { %v814_v41 = vsel %vm809_vm7, %v806_v35, %v1297_v40 }
 0x284   :  { %v831_v42 = vpack.c.bf16 %v814_v41, %v814_v41 }
 0x286   :  { %889 = vmatmul.bf16.vlgmr.msra.gmra.mxu0 %v831_v42 }
 0x303   :  { %v890_v44 = vpop.f32.mrf.mxu0 }
 0x304   :  { %v891_v45 = vadd.f32 %v890_v44, %v832_v43 }
 0x306   :  { %894 = vst [vmem:[%s1586_s3] sm:$0xff] %v891_v45  ;;  %v896_v46 = vsub.f32 0.0, %v891_v45  ;;  %v916_v47 = vand.u32 2147483647, %v891_v45  ;;  %v915_v59 = vmax.f32 %v891_v45, 0.0  ;;  %s1506_s3 = smov 124  }
 0x308   :  { %v897_v48 = vmul.f32 1.442695, %v896_v46  ;;  %v917_v49 = vsub.f32 0.0, %v916_v47 }
 0x30a   :  { %1440 = vpow2.f32 %v897_v48  ;;  %v918_v50 = vmul.f32 1.442695, %v917_v49 }
 0x30b   :  { %v892_v22 = vpop.f32.mrf.mxu0 }
 0x30c   :  { %1442 = vpow2.f32 %v918_v50 }
 0x310   :  { %v1441_v51 = vpop.eup %1440 }
 0x311   :  { %v899_v52 = vadd.f32 1.0, %v1441_v51 }
 0x312   :  { %v1443_v53 = vpop.eup %1442 }
 0x313   :  { %1444 = vrcp.f32 %v899_v52  ;;  %v920_v55 = vadd.f32 1.0, %v1443_v53  ;;  %v911_v62 = vand.u32 2147483648, %v899_v52  ;;  %v909_v54 = vand.u32 2147483647, %v899_v52 }
 0x314   :  { %vm905_vm9 = vweird.f32 %v899_v52 }
 0x315   :  { %1446 = vlog2.f32 %v920_v55  ;;  %v912_v2 = vor.u32 1.1754944e-38, %v911_v62  ;;  %vm910_vm12 = vcmp.eq.f32.partialorder %v909_v54, 8.507059e+37 }
 0x319   :  { %v1445_v56 = vpop.eup %1444 }
 0x31a   :  { %v901_v57 = vmul.f32 %v1445_v56, %v899_v52  ;;  %vm906_vm8 = vweird.f32 %v1445_v56 }
 0x31b   :  { %v1447_v58 = vpop.eup %1446  ;;  %vm907_vm11 = vmor %vm905_vm9, %vm906_vm8 }
 0x31c   :  { %v922_v60 = vmul.f32 0.6931472, %v1447_v58  ;;  %v902_v61 = vsub.f32 1.0, %v901_v57 }
 0x31e   :  { %v923_v63 = vadd.f32 %v922_v60, %v915_v59  ;;  %v903_v15 = vmul.f32 %v1445_v56, %v902_v61 }
 0x320   :  { %v924_v0 = vadd.f32 1.0, %v923_v63  ;;  %v904_v1 = vadd.f32 %v1445_v56, %v903_v15 }
 0x322   :  { %v925_v3 = vmul.f32 5.0, %v924_v0  ;;  %v908_v4 = vsel %vm907_vm11, %v1445_v56, %v904_v1 }
 0x323   :  { %v913_v5 = vsel %vm910_vm12, %v912_v2, %v908_v4 }
 0x324   :  { %927 = vrot.lane.b32.xlu0 %v925_v3, %s1506_s3  ;;  %932 = vst.msk [vmem:[%s1587_s4] sm:$0xff] %vm931_vm10, %v913_v5 }
 0x396   :  { %v928_v6 = vpop.permute.xlu0 %927 }
 0x397   :  { %v930_v7 = vmul.f32 %v928_v6, %v913_v5 }
 0x399   :  { %v933_v8 = vadd.f32 1e-06, %v930_v7  ;;  %936 = vrot.lane.b32.xlu0 %v930_v7, %s1505_s10 }
 0x39b   :  { %934 = vst.msk [vmem:[%s1588_s5] sm:$0xff] %vm931_vm10, %v933_v8 }
 0x40b   :  { %v937_v9 = vpop.permute.xlu0 %936 }
 0x40c   :  { %v939_v10 = vsub.f32 %v925_v3, %v937_v9 }
 0x40e   :  { %v940_v11 = vadd.f32 0.0001, %v939_v10 }
 0x410   :  { %942 = vrot.lane.b32.xlu1 %v940_v11, %s1506_s3 }
 0x482   :  { %v943_v12 = vpop.permute.xlu1 %942 }
 0x483   :  { %945 = vst.msk [vmem:[%s1589_s6] sm:$0xff] %vm931_vm10, %v943_v12 }
 0x484   :  { %962 = vsyncpa [#allocation3], 1 }
 0x485   :  { %963 = vsyncpa [#allocation5], 1 }

</bundles_post_ra>
